<compile_context>
chip_gen: v5e
topology: v5e:2x2
jax: 0.10.0
libtpu: 0.0.40
codegen_flags: <defaults>
</compile_context>

<pallas_src>
import jax
import jax.numpy as jnp
from jax.experimental import pallas as pl
from jax.experimental.pallas import tpu as pltpu


_TARGET_TILE_BYTES = 4 * 1024 * 1024   # per-buffer f32 tile target (~4 MiB)
_VMEM_LIMIT_BYTES = 40 * 1024 * 1024   # 2x(x) + 2x(out) + 2x(pe) tiles + headroom;
                                        # safely below v7x's 64 MiB physical VMEM.


def generate_positional_encoding(d_model: int, height: int, width: int) -> jnp.ndarray:
    """Replicates PositionalEncoding.generate_positional_encoding exactly.

    Returns array of shape (d_model, height, width), float32.
    """
    assert d_model % 2 == 0, "d_model must be even (matches the PyTorch loop)"
    ys = jnp.arange(height, dtype=jnp.float32)[:, None, None]        # (H,1,1)
    xs = jnp.arange(width, dtype=jnp.float32)[None, :, None]         # (1,W,1)
    i = jnp.arange(0, d_model, 2, dtype=jnp.float32)[None, None, :]  # (1,1,D/2)

    # pe[y, x, i]     = sin(x / 10000 ** (i / d_model))
    # pe[y, x, i + 1] = cos(y / 10000 ** ((i + 1) / d_model))
    even = jnp.sin(xs / jnp.power(10000.0, i / d_model))              # (1,W,D/2)
    odd = jnp.cos(ys / jnp.power(10000.0, (i + 1.0) / d_model))       # (H,1,D/2)
    even = jnp.broadcast_to(even, (height, width, d_model // 2))
    odd = jnp.broadcast_to(odd, (height, width, d_model // 2))

    pe_hwc = jnp.stack([even, odd], axis=-1).reshape(height, width, d_model)
    # .permute(2, 0, 1) -> (d_model, H, W)
    return jnp.transpose(pe_hwc, (2, 0, 1)).astype(jnp.float32)


def _add_pe_kernel(x_ref, pe_ref, o_ref):
    # Works for both layouts:
    #   lane-dense path: x_ref/o_ref/pe_ref are (tile_rows, lane)
    #   fallback path:   x_ref/o_ref/pe_ref are (C, H, W)
    o_ref[...] = x_ref[...] + pe_ref[...]


def _choose_lane_tiling(n_elems: int, target_tile_bytes: int):
    """Pick (lane, rows, tile_rows) for a lane-dense (rows, lane) view of a
    feature volume with n_elems elements.  Returns None if no multiple of 128
    divides n_elems (caller falls back to NCHW blocking)."""
    lane = None
    for cand in (2048, 1024, 512, 256, 128):
        if n_elems % cand == 0:
            lane = cand
            break
    if lane is None:
        return None
    rows = n_elems // lane
    target_rows = max(8, target_tile_bytes // (lane * 4))  # f32
    if target_rows >= rows:
        tile_rows = rows                       # full extent (always legal)
    else:
        tile_rows = max(8, (target_rows // 8) * 8)  # multiple of 8 sublanes
    return lane, rows, tile_rows


def positional_encoding_forward(
    x: jnp.ndarray,
    pe: jnp.ndarray,
    *,
    target_tile_bytes: int = _TARGET_TILE_BYTES,
) -> jnp.ndarray:
    """x: (B, C, H, W) float32; pe: (C, h, w) float32 -> (B, C, H, W).

    If (h, w) != (H, W), PE is bilinearly resized (align_corners=False
    semantics, matching F.interpolate) before the broadcast add.
    """
    B, C, H, W = x.shape
    if pe.shape[0] != C:
        raise ValueError("channel mismatch between x and positional encoding")

    if pe.shape[1] != H or pe.shape[2] != W:
        # Matches F.interpolate(..., mode='bilinear', align_corners=False):
        # jax.image.resize with 'bilinear' uses half-pixel centers, no antialias.
        pe = jax.image.resize(pe, (C, H, W), method="bilinear", antialias=False)
    pe = pe.astype(x.dtype)

    n = C * H * W
    tiling = _choose_lane_tiling(n, target_tile_bytes)

    if tiling is None:
        # Fallback (C*H*W not a multiple of 128): one batch element per grid
        # step, full (C, H, W) blocks (always a legal block shape).
        return pl.pallas_call(
            _add_pe_kernel,
            out_shape=jax.ShapeDtypeStruct((B, C, H, W), x.dtype),
            grid_spec=pltpu.PrefetchScalarGridSpec(
                num_scalar_prefetch=0,
                grid=(B,),
                in_specs=[
                    pl.BlockSpec((pl.Squeezed(), C, H, W), lambda b: (b, 0, 0, 0)),
                    pl.BlockSpec((C, H, W), lambda b: (0, 0, 0)),
                ],
                out_specs=pl.BlockSpec((pl.Squeezed(), C, H, W), lambda b: (b, 0, 0, 0)),
            ),
            compiler_params=pltpu.CompilerParams(
                dimension_semantics=("parallel",),
            ),
        )(x, pe)

    lane, rows, tile_rows = tiling

    # Layout plumbing (outside the kernel): flatten to a lane-dense 2D view.
    x2 = x.reshape(B, rows, lane)
    pe2 = pe.reshape(rows, lane)
    n_row_tiles = pl.cdiv(rows, tile_rows)

    out2 = pl.pallas_call(
        _add_pe_kernel,
        out_shape=jax.ShapeDtypeStruct((B, rows, lane), x.dtype),
        grid_spec=pltpu.PrefetchScalarGridSpec(
            num_scalar_prefetch=0,
            # Batch is the innermost axis: the PE tile's block index does not
            # change across consecutive steps, so it is not re-fetched per b.
            grid=(n_row_tiles, B),
            in_specs=[
                pl.BlockSpec((pl.Squeezed(), tile_rows, lane), lambda j, b: (b, j, 0)),
                pl.BlockSpec((tile_rows, lane), lambda j, b: (j, 0)),
            ],
            out_specs=pl.BlockSpec((pl.Squeezed(), tile_rows, lane), lambda j, b: (b, j, 0)),
        ),
        compiler_params=pltpu.CompilerParams(
            # Both axes independent -> megacore (v7x) can shard the row-tile
            # axis even when B == 1; neutral on single-TC chips.
            dimension_semantics=("parallel", "parallel"),
            vmem_limit_bytes=_VMEM_LIMIT_BYTES,
        ),
    )(x2, pe2)

    return out2.reshape(B, C, H, W)


if __name__ == "__main__":
    key = jax.random.PRNGKey(0)

    # --- Case 1: module-sized example (d_model=4, 16x16 spatial) ---------------
    B, C, H, W = 2, 4, 16, 16
    k1, k2, k3, k4 = jax.random.split(key, 4)
    x = jax.random.normal(k1, (B, C, H, W), dtype=jnp.float32)
    pe = generate_positional_encoding(d_model=C, height=H, width=W)
    out = jax.block_until_ready(positional_encoding_forward(x, pe))
    ref = x + pe[None, ...]
    assert out.shape == (B, C, H, W)
    assert jnp.allclose(out, ref, atol=1e-6), "mismatch vs reference (case 1)"

    # --- Case 2: exercises multi-tile grid + partial last row-block ------------
    B2, C2, H2, W2 = 2, 4, 40, 128   # rows=10, tile_rows=8 with a tiny tile target
    x_b = jax.random.normal(k2, (B2, C2, H2, W2), dtype=jnp.float32)
    pe_b = generate_positional_encoding(d_model=C2, height=H2, width=W2)
    out_b = jax.block_until_ready(
        positional_encoding_forward(x_b, pe_b, target_tile_bytes=8 * 2048 * 4)
    )
    ref_b = x_b + pe_b[None, ...]
    assert jnp.allclose(out_b, ref_b, atol=1e-6), "mismatch vs reference (case 2)"

    # --- Case 3: non-lane-dense fallback path (C*H*W % 128 != 0) ---------------
    B3, C3, H3, W3 = 2, 2, 5, 7
    x_c = jax.random.normal(k3, (B3, C3, H3, W3), dtype=jnp.float32)
    pe_c = generate_positional_encoding(d_model=C3, height=H3, width=W3)
    out_c = jax.block_until_ready(positional_encoding_forward(x_c, pe_c))
    ref_c = x_c + pe_c[None, ...]
    assert jnp.allclose(out_c, ref_c, atol=1e-6), "mismatch vs reference (case 3)"

    # --- Case 4: spatial-mismatch (bilinear resize of PE before the add) -------
    # PE built for 16x16, input is 20x24 -> PE resized outside the kernel,
    # then the same lane-dense add kernel runs (20*24*4 = 1920 = 15 * 128).
    B4, C4 = 2, 4
    x_d = jax.random.normal(k4, (B4, C4, 20, 24), dtype=jnp.float32)
    pe_d = generate_positional_encoding(d_model=C4, height=16, width=16)
    out_d = jax.block_until_ready(positional_encoding_forward(x_d, pe_d))
    pe_d_resized = jax.image.resize(pe_d, (C4, 20, 24), method="bilinear",
                                    antialias=False)
    ref_d = x_d + pe_d_resized[None, ...]
    assert jnp.allclose(out_d, ref_d, atol=1e-5), "mismatch vs reference (case 4)"

    print("KERNEL_OK")
</pallas_src>

<mosaic_0001>
module attributes {stable_mosaic.version = 11 : i64} {
  func.func @_add_pe_kernel(%arg0: i32, %arg1: i32, %arg2: memref<1x1x1024xf32, #tpu.memory_space<vmem>>, %arg3: memref<1x1024xf32, #tpu.memory_space<vmem>>, %arg4: memref<1x1x1024xf32, #tpu.memory_space<vmem>>) attributes {dimension_semantics = [#tpu.dimension_semantics<parallel>, #tpu.dimension_semantics<parallel>], iteration_bounds = array<i64: 1, 2>, scalar_prefetch = 0 : i64, scratch_operands = 0 : i64, tpu.core_type = #tpu.core_type<tc>, window_params = [{transform_indices = @transform_0, window_bounds = array<i64: 1, 1, 1024>}, {transform_indices = @transform_1, window_bounds = array<i64: 1, 1024>}, {transform_indices = @transform_2, window_bounds = array<i64: 1, 1, 1024>}]} {
    %c0 = arith.constant 0 : index
    %c0_0 = arith.constant 0 : index
    %c0_1 = arith.constant 0 : index
    %0 = vector.load %arg2[%c0, %c0_0, %c0_1] : memref<1x1x1024xf32, #tpu.memory_space<vmem>>, vector<1x1x1024xf32>
    %1 = vector.shape_cast %0 : vector<1x1x1024xf32> to vector<1x1024xf32>
    %c0_2 = arith.constant 0 : index
    %c0_3 = arith.constant 0 : index
    %2 = vector.load %arg3[%c0_2, %c0_3] : memref<1x1024xf32, #tpu.memory_space<vmem>>, vector<1x1024xf32>
    %3 = arith.addf %1, %2 : vector<1x1024xf32>
    %c0_4 = arith.constant 0 : index
    %c0_5 = arith.constant 0 : index
    %c0_6 = arith.constant 0 : index
    %4 = vector.load %arg4[%c0_4, %c0_5, %c0_6] : memref<1x1x1024xf32, #tpu.memory_space<vmem>>, vector<1x1x1024xf32>
    %5 = vector.shape_cast %4 : vector<1x1x1024xf32> to vector<1x1024xf32>
    %6 = vector.shape_cast %3 : vector<1x1024xf32> to vector<1x1x1024xf32>
    tpu.vector_store %arg4[%c0_4, %c0_5, %c0_6], %6 {strides = array<i32>} : memref<1x1x1024xf32, #tpu.memory_space<vmem>>, vector<1x1x1024xf32>,
    return
  }
  func.func @transform_0(%arg0: i32, %arg1: i32) -> (i32, i32, i32) {
    %c0_i32 = arith.constant 0 : i32
    %c0_i32_0 = arith.constant 0 : i32
    return %arg1, %arg0, %c0_i32 : i32, i32, i32
  }
  func.func @transform_1(%arg0: i32, %arg1: i32) -> (i32, i32) {
    %c0_i32 = arith.constant 0 : i32
    %c0_i32_0 = arith.constant 0 : i32
    return %arg0, %c0_i32 : i32, i32
  }
  func.func @transform_2(%arg0: i32, %arg1: i32) -> (i32, i32, i32) {
    %c0_i32 = arith.constant 0 : i32
    %c0_i32_0 = arith.constant 0 : i32
    return %arg1, %arg0, %c0_i32 : i32, i32, i32
  }
}

</mosaic_0001>

<bundles_post_ra>
// kernel: tpu_custom_call.1
= control target key start
LH: loop header
LB: loop body
LE: loop exit
PB: predicated region body
PF: predicated region fallthrough
CT: control target
= control target key end

     0   :  { %7 = vsyncpa [#allocation3], 0  ;;  %s718_s0 = inlined_call_operand.hbm [shape: f32[2,1,1024], index: 0, kind: input, shape index: {}]   ;;  %s719_s1 = inlined_call_operand.hbm [shape: f32[1,1024], index: 1, kind: input, shape index: {}]   ;;  %s720_s2 = inlined_call_operand.hbm [shape: f32[2,1,1024], index: 2, kind: output, shape index: {}]  }
   0x1   :  { %9 = vsyncpa [#allocation3 + $0x1], 0 }
   0x2   :  { %10 = vsyncpa [#allocation6], 0 }
   0x3   :  { %11 = vsyncpa [#allocation4], 0 }
   0x4   :  { %13 = vsyncpa [#allocation4 + $0x1], 0  ;;  %s569_s9 = smov 0   ;;  %s571_s10 = smov 0  }
   0x5   :  { %s573_s11 = smov 0   ;;  %s575_s12 = smov 0  }
   0x6   :  { %s577_s13 = smov 0   ;;  %s579_s14 = smov 0  }
   0x7 LB: > { %s317_s15 = sadd.s32 4294967295, %s551_s14   ;;  %s318_s16 = sadd.s32 4294967294, %s551_s14   ;;  %s551_s14 = sphi %s579_s14, %s19_s14   ;;  %s547_s13 = sphi %s577_s13, %s732_s13   ;;  %s543_s12 = sphi %s575_s12, %s731_s12   ;;  %s539_s11 = sphi %s573_s11, %s730_s11   ;;  %s535_s10 = sphi %s571_s10, %s729_s10   ;;  %s531_s9 = sphi %s569_s9, %s728_s9  }
   0x8   : > { %p53_p0 = scmp.ne.s32.totalorder %s535_s10, %s531_s9  ;;  %p603_p1 = scmp.eq.s32.totalorder %s317_s15, 0 }
   0x9   : > { %p607_p2 = scmp.eq.s32.totalorder %s317_s15, 1  ;;  %p111_p3 = scmp.eq.s32.totalorder %s318_s16, 1 }
   0xa   : > { %p613_p4 = por %p603_p1, %p53_p0  ;;  %p319_p5 = scmp.ge.s32.totalorder %s551_s14, 1 }
   0xb   : > { %p618_p6 = por %p111_p3, %p53_p0  ;;  %p118_p7 = scmp.lt.s32.totalorder %s551_s14, 3 }
   0xc   : > { %s132_s23 = sshll.u32 %s719_s1, 4  ;;  %p321_p9 = scmp.ge.s32.totalorder %s551_s14, 2  ;;  %s133_s23 = int_to_ptr.hbm [resolvable:$true] %s132_s23 }
   0xd   : > { %p626_p8 = pnand %p319_p5, %p118_p7  ;;  %s553_s25 = smov [#allocation5]  }
   0xe   : > { %s134_s26 = sshll.u32 %s553_s25, 4  ;;  %s28_s27 = sadd.s32 1, %s547_s13  ;;  %s135_s26 = int_to_ptr.vmem [resolvable:$true] %s134_s26 }
   0xf   : > { %p340_p10 = pneg %p626_p8  ;;  %p29_p12 = scmp.ge.s32.totalorder %s28_s27, 2 }
  0x10   : > { %s40_s28 = sadd.s32 1, %s539_s11  ;;  %p47_p13 = scmp.ne.s32.totalorder %s539_s11, %s535_s10 }
  0x11   : > { %p341_p11 = pnand %p340_p10, %p603_p1  ;;  %p48_p0 = scmp.eq.s32.totalorder %s551_s14, 0 }
  0x12   : > { %s734_s27 = smov (%p29_p12, %s28_s27), 0  ;;  %p648_p5 = por %p607_p2, %p47_p13 }
  0x13   : > { %343 = dma.hbm_to_vmem [thread:$0]  (!%p341_p11), %s133_s23, 128, %s135_s26, [#allocation6]  }
  0x14   : > { %p642_p3 = por %p48_p0, %p47_p13  ;;  %s35_s3 = ssub.s32 %s547_s13, %s734_s27 }
  0x15   : > { %p353_p7 = scmp.lt.s32.totalorder %s551_s14, 2  ;;  %p38_p10 = scmp.eq.s32.totalorder %s35_s3, 0 }
  0x16   : > { %s145_s4 = sand.u32 1, %s539_s11   ;;  %s323_s7 = sshll.u32 %s547_s13, 3 }
  0x17   : > { %s322_s5 = sshll.u32 %s145_s4, 3  ;;  %s155_s16 = scalar_lea.hbm %s718_s0, %s323_s7 }
  0x18   : > { %s657_s6 = scalar_select %p38_p10, %s539_s11, %s40_s28  }
  0x19   : > { %s149_s21 = scalar_lea.vmem [#allocation2], %s322_s5  ;;  %s157_s18 = sshll.u32 %s155_s16, 4  ;;  %s158_s18 = int_to_ptr.hbm [resolvable:$true] %s157_s18 }
  0x1a   : > { %s159_s22 = sshll.u32 %s149_s21, 4  ;;  %p345_p2 = pnand %p353_p7, %p642_p3  ;;  %s160_s22 = int_to_ptr.vmem [resolvable:$true] %s159_s22 }
  0x1b   : > { %s146_s23 = scalar_lea.sflag [#allocation3], %s145_s4  ;;  %168 = sbr.rel (%p626_p8) target bundleno = 50 (0x32), region = 28 }
  0x1c   : > { %347 = dma.hbm_to_vmem [thread:$0]  (!%p345_p2), %s158_s18, 128, %s160_s22, %s146_s23  }
  0x1d   : > { %s668_s25 = sand.u32 (!%p626_p8), 1, %s535_s10  }
  0x1e   : > { %s325_s26 = sshll.u32 (!%p626_p8), %s668_s25, 3  ;;  %s171_s28 = scalar_lea.sflag (!%p626_p8), [#allocation3], %s668_s25 }
  0x1f   : > { %s174_s3 = scalar_lea.vmem (!%p626_p8), [#allocation2], %s325_s26 }
  0x20   : > { %518 = dma.done.wait (%p613_p4), %s171_s28, 128  }
  0x21   : > { %520 = vsyncadd (%p613_p4), %s171_s28, 4294967168 }
  0x22   : > { %522 = dma.done.wait (%p603_p1), [#allocation6], 128  }
  0x23   : > { %524 = vsyncadd (%p603_p1), [#allocation6], 4294967168  ;;  %s329_s24 = sshll.u32 %s543_s12, 3  ;;  %s200_s7 = scalar_lea.vmem [#allocation7], %s325_s26  ;;  %v201_v0 = vld [vmem:[%s174_s3] sm:$0xff]  ;;  %v202_v1 = vld [vmem:[#allocation5] sm:$0xff] }
  0x24   : > { %s218_s5 = scalar_lea.hbm %s720_s2, %s329_s24  ;;  %s220_s8 = sshll.u32 %s200_s7, 4  ;;  %v203_v2 = vadd.f32 %v202_v1, %v201_v0  ;;  %s221_s8 = int_to_ptr.vmem [resolvable:$true] %s220_s8 }
  0x25   : > { %s222_s15 = sshll.u32 %s218_s5, 4  ;;  %s206_s19 = scalar_lea.sflag [#allocation4], %s668_s25  ;;  %s223_s15 = int_to_ptr.hbm [resolvable:$true] %s222_s15 }
  0x26   : > { %204 = vst [vmem:[%s200_s7] sm:$0xff] %v203_v2  ;;  %s479_s17 = sshra.s32 %s223_s15, 4  ;;  %s485_s22 = scalar_lea.hbm %s720_s2, 16  ;;  %s480_s17 = int_to_ptr.hbm [resolvable:$true] %s479_s17 }
  0x27   : > { %s481_s16 = scalar_lea.hbm %s480_s17, 8  ;;  %p486_p11 = scmp.lt.s32.totalorder %s480_s17, %s720_s2 }
  0x28   : > { %p482_p1 = scmp.ne.s32.totalorder %s480_s17, %s481_s16  ;;  %p487_p12 = scmp.lt.s32.totalorder %s485_s22, %s481_s16 }
  0x2a   : > { %p483_p4 = pnand %p482_p1, %p648_p5  ;;  %p488_p13 = por %p487_p12, %p486_p11 }
  0x2c   : > { %p484_p8 = pneg %p483_p4 }
  0x2e   : > { %p489_p0 = pnand %p488_p13, %p484_p8 }
  0x30   : > { %492 = shalt.err (!%p489_p0)
}
  0x31   : > { %338 = dma.vmem_to_hbm [thread:$0]  (%p648_p5), %s221_s8, 128, %s223_s15, %s206_s19  }
  0x32 PF: > { %s234_s25 = sand.u32 1, %s531_s9   ;;  %p349_p3 = pnand %p321_p9, %p618_p6 }
  0x33   : > { %s235_s26 = scalar_lea.sflag [#allocation4], %s234_s25 }
  0x34   : > { %p350_p7 = pneg %p349_p3 }
  0x36   : > { %526 = dma.done.wait (%p350_p7), %s235_s26, 128  }
  0x37   : > { %528 = vsyncadd (%p350_p7), %s235_s26, 4294967168  ;;  %s19_s14 = sadd.s32 1, %s551_s14   ;;  %s728_s9 = smov %s535_s10 }
  0x38   : > { %p16_p10 = scmp.ge.s32.totalorder %s19_s14, 4   ;;  %s729_s10 = smov %s539_s11 }
  0x39   : > { %s730_s11 = smov %s657_s6  ;;  %s731_s12 = smov %s547_s13 }
  0x3a   : > { %s732_s13 = smov %s734_s27  ;;  %18 = sbr.rel (!%p16_p10) target bundleno = 7 (0x7), region = 78 }
  0x3f   :  { %241 = vsyncpa [#allocation3], 1 }
  0x40   :  { %243 = vsyncpa [#allocation3 + $0x1], 1 }
  0x41   :  { %244 = vsyncpa [#allocation6], 1 }
  0x42   :  { %245 = vsyncpa [#allocation4], 1 }
  0x43   :  { %247 = vsyncpa [#allocation4 + $0x1], 1 }

</bundles_post_ra>
